<compile_context>
chip_gen: v6e
topology: v6e:2x2x1
jax: 0.10.0
libtpu: 0.0.40
codegen_flags: <defaults>
</compile_context>

<pallas_src>
import jax
import jax.numpy as jnp
from jax.experimental import pallas as pl
from jax.experimental.pallas import tpu as pltpu


def _round_up(x, m):
    return ((x + m - 1) // m) * m


def _device_kind():
    try:
        return jax.devices()[0].device_kind.lower()
    except Exception:
        return ""


def _num_tensorcores():
    # v7x has 2 TensorCores per chip; v5e / v6e have 1.
    return 2 if "v7" in _device_kind() else 1


def _default_compute_dtype():
    # On v5e the MXU does f32 as a slow multi-pass decomposition -> bf16 default
    # (weights cast once at prepare time, f32 accumulation kept in-kernel).
    k = _device_kind()
    if "v5e" in k or "v5 lite" in k or "v5lite" in k:
        return jnp.bfloat16
    return jnp.float32


# --------------------------------------------------------------------------
# Kernel
# --------------------------------------------------------------------------
def critic_kernel(s_ref, a_ref, w1_ref, w2s_ref, w2a_ref, w3_ref, b_ref, out_ref):
    h1p = w1_ref.shape[1]        # padded first_hidden
    h2p = w2s_ref.shape[1]       # padded second_hidden
    a_dim = a_ref.shape[1]
    n_groups = out_ref.shape[0]  # tb // 128

    # ---- layer 1 + ReLU (f32 MXU accumulation, f32 bias/ReLU) ----
    h1 = jnp.dot(s_ref[...], w1_ref[...], preferred_element_type=jnp.float32)
    h1 = jnp.maximum(h1 + b_ref[0:1, :h1p], 0.0)

    # ---- layer 2: cat([h1, a]) @ W2  ==  h1 @ W2_s + a @ W2_a ----
    # State path on the MXU; the K=a_dim (tiny) action path as unrolled VPU
    # broadcast-MACs so it does not burn a nearly-empty MXU pass.
    h2 = jnp.dot(h1.astype(w2s_ref.dtype), w2s_ref[...],
                 preferred_element_type=jnp.float32)
    h2 = h2 + b_ref[1:2, :h2p]
    a32 = a_ref[...].astype(jnp.float32)
    w2a32 = w2a_ref[...].astype(jnp.float32)
    for k in range(a_dim):                      # static -> unrolled
        h2 = h2 + a32[:, k:k + 1] * w2a32[k:k + 1, :]
    h2 = jnp.maximum(h2, 0.0)

    # ---- layer 3: scalar Q head (w3 padded to 128 output lanes, lane 0 valid)
    q = jnp.dot(h2.astype(w3_ref.dtype), w3_ref[...],
                preferred_element_type=jnp.float32)
    q = q + b_ref[2:3, :128]

    # ---- pack q's column into lanes: out[g, c] = q[g*128 + c, 0] ----
    # One 128x128 XLU transpose per 128 rows (XLU otherwise idle); gives a
    # lane-dense output block and ~128x less HBM writeback than storing q.
    for g in range(n_groups):                   # static -> unrolled
        qt = jnp.transpose(q[g * 128:(g + 1) * 128, :])
        out_ref[g:g + 1, :] = qt[0:1, :].astype(out_ref.dtype)


# --------------------------------------------------------------------------
# One-time parameter packing (NOT on the per-call critical path)
# --------------------------------------------------------------------------
def prepare_params(params, input_dim, action_dim, first_hidden, second_hidden,
                   compute_dtype=None):
    """Pad/split/pack parameters once. Returns the tuple fed to critic_forward."""
    if compute_dtype is None:
        compute_dtype = _default_compute_dtype()
    w1, b1, w2, b2, w3, b3 = params
    h1p = _round_up(first_hidden, 128)
    h2p = _round_up(second_hidden, 128)
    hb = max(h1p, h2p, 128)

    w1_p = jnp.zeros((input_dim, h1p), compute_dtype)
    w1_p = w1_p.at[:, :first_hidden].set(w1.astype(compute_dtype))

    w2_s = w2[:first_hidden, :]          # state-path rows (concat hoisted here)
    w2_a = w2[first_hidden:, :]          # action-path rows
    w2s_p = jnp.zeros((h1p, h2p), compute_dtype)
    w2s_p = w2s_p.at[:first_hidden, :second_hidden].set(w2_s.astype(compute_dtype))
    w2a_p = jnp.zeros((action_dim, h2p), compute_dtype)
    w2a_p = w2a_p.at[:, :second_hidden].set(w2_a.astype(compute_dtype))

    w3_p = jnp.zeros((h2p, 128), compute_dtype)
    w3_p = w3_p.at[:second_hidden, :1].set(w3.astype(compute_dtype))

    # biases kept in f32 (added to the f32 accumulator), packed into one buffer
    biases = jnp.zeros((3, hb), jnp.float32)
    biases = biases.at[0, :first_hidden].set(b1.reshape(-1).astype(jnp.float32))
    biases = biases.at[1, :second_hidden].set(b2.reshape(-1).astype(jnp.float32))
    biases = biases.at[2, :1].set(b3.reshape(-1).astype(jnp.float32))

    return (w1_p, w2s_p, w2a_p, w3_p, biases)


# --------------------------------------------------------------------------
# Batch-tile selection
# --------------------------------------------------------------------------
def _choose_batch_tile(B, block_b, n_tc):
    """Tile is a multiple of 128 (output packing); when the grid has more than
    one step it is a multiple of 1024 so the packed output block
    (tile//128, 128) keeps a sublane-aligned (multiple-of-8) first dim.
    On multi-TC chips (v7x) the tile is capped so the grid has >= 2*n_tc steps."""
    b128 = _round_up(B, 128)
    if n_tc == 1 and b128 <= block_b:
        return b128                               # single tile
    tb = max(1024, (block_b // 1024) * 1024)
    if n_tc > 1:
        per_core = _round_up(max(1, -(-B // (2 * n_tc))), 1024)
        tb = min(tb, per_core)
    return b128 if b128 <= tb else tb


# --------------------------------------------------------------------------
# Forward wrapper
# --------------------------------------------------------------------------
def critic_forward(state, action, packed, *, block_b=2048):
    w1_p, w2s_p, w2a_p, w3_p, biases = packed
    B, in_dim = state.shape
    a_dim = action.shape[1]
    h1p, h2p = w1_p.shape[1], w2s_p.shape[1]
    cdtype = w1_p.dtype

    state = state.astype(cdtype)
    action = action.astype(cdtype)

    n_tc = _num_tensorcores()
    tb = _choose_batch_tile(B, max(block_b, 128), n_tc)
    b_pad = _round_up(B, tb)
    if b_pad != B:
        # Only when B is not tile-aligned; pad traffic is ~80 B/row of inputs,
        # negligible next to the ~128x output-writeback saving from packing.
        state = jnp.pad(state, ((0, b_pad - B), (0, 0)))
        action = jnp.pad(action, ((0, b_pad - B), (0, 0)))

    n_groups = tb // 128
    out_rows = b_pad // 128

    out = pl.pallas_call(
        critic_kernel,
        out_shape=jax.ShapeDtypeStruct((out_rows, 128), jnp.float32),
        grid_spec=pltpu.PrefetchScalarGridSpec(
            num_scalar_prefetch=0,
            grid=(b_pad // tb,),
            in_specs=[
                # activations: blocked over batch, double-buffered by Pallas
                pl.BlockSpec((tb, in_dim), lambda i: (i, 0)),
                pl.BlockSpec((tb, a_dim), lambda i: (i, 0)),
                # weights / biases: constant block index -> VMEM-resident
                pl.BlockSpec((in_dim, h1p), lambda i: (0, 0)),
                pl.BlockSpec((h1p, h2p), lambda i: (0, 0)),
                pl.BlockSpec((a_dim, h2p), lambda i: (0, 0)),
                pl.BlockSpec((h2p, 128), lambda i: (0, 0)),
                pl.BlockSpec(biases.shape, lambda i: (0, 0)),
            ],
            # lane-dense packed q: 128 batch rows per output row
            out_specs=pl.BlockSpec((n_groups, 128), lambda i: (i, 0)),
        ),
        compiler_params=pltpu.CompilerParams(
            dimension_semantics=("parallel",),    # shard batch grid across TCs (v7x)
            vmem_limit_bytes=32 * 1024 * 1024,    # safe on v7x's 64 MiB physical VMEM
        ),
    )(state, action, w1_p, w2s_p, w2a_p, w3_p, biases)

    # Unpack: row-major flatten recovers batch order (out[g, c] = q[g*128 + c]).
    # Tiny (4 B / batch row), unlike the old (b_pad, 128) slice.
    return out.reshape(-1)[:B].reshape(B, 1)


# --------------------------------------------------------------------------
# Init + pure-JAX reference
# --------------------------------------------------------------------------
def init_params(key, input_dim, action_dim, first_hidden, second_hidden):
    """Init matching the PyTorch module's scheme (weights stored (in, out))."""
    k1, k2, k3, kb1, kb2, kb3 = jax.random.split(key, 6)

    def xavier_uniform(k, fan_in, fan_out):
        bound = jnp.sqrt(6.0 / (fan_in + fan_out))
        return jax.random.uniform(k, (fan_in, fan_out), jnp.float32, -bound, bound)

    def bias_default(k, fan_in, n_out):
        bound = 1.0 / jnp.sqrt(fan_in)
        return jax.random.uniform(k, (1, n_out), jnp.float32, -bound, bound)

    w1 = xavier_uniform(k1, input_dim, first_hidden)
    b1 = bias_default(kb1, input_dim, first_hidden)
    w2 = xavier_uniform(k2, first_hidden + action_dim, second_hidden)
    b2 = bias_default(kb2, first_hidden + action_dim, second_hidden)
    w3 = jax.random.uniform(k3, (second_hidden, 1), jnp.float32, -0.003, 0.003)
    b3 = bias_default(kb3, second_hidden, 1)
    return (w1, b1, w2, b2, w3, b3)


def critic_reference(state, action, params):
    (w1, b1, w2, b2, w3, b3) = params
    s = jnp.maximum(state @ w1 + b1, 0.0)
    x = jnp.concatenate([s, action], axis=1)
    x = jnp.maximum(x @ w2 + b2, 0.0)
    return x @ w3 + b3


# --------------------------------------------------------------------------
if __name__ == "__main__":
    # ---- small config matching the module ----
    B, input_dim, action_dim = 8, 16, 4
    first_hidden, second_hidden = 32, 32

    key = jax.random.PRNGKey(0)
    ks, ka, kp, ks2, ka2, kp2 = jax.random.split(key, 6)
    state = jax.random.normal(ks, (B, input_dim), jnp.float32)
    action = jax.random.normal(ka, (B, action_dim), jnp.float32)
    params = init_params(kp, input_dim, action_dim, first_hidden, second_hidden)
    ref = critic_reference(state, action, params)

    # float32 path: matches the reference tightly
    packed_f32 = prepare_params(params, input_dim, action_dim,
                                first_hidden, second_hidden,
                                compute_dtype=jnp.float32)
    out = jax.block_until_ready(critic_forward(state, action, packed_f32))
    assert out.shape == (B, 1)
    assert jnp.allclose(out, ref, atol=1e-4, rtol=1e-4)

    # bfloat16 path (MXU-native; default on v5e), f32 accumulation, looser tol
    packed_bf16 = prepare_params(params, input_dim, action_dim,
                                 first_hidden, second_hidden,
                                 compute_dtype=jnp.bfloat16)
    out_bf16 = jax.block_until_ready(critic_forward(state, action, packed_bf16))
    assert out_bf16.shape == (B, 1)
    assert jnp.allclose(out_bf16, ref, atol=5e-2, rtol=5e-2)

    # ---- multi-tile grid + packed-output path (grid > 1, batch padding) ----
    B2, fh2, sh2 = 2240, 96, 160
    state2 = jax.random.normal(ks2, (B2, input_dim), jnp.float32)
    action2 = jax.random.normal(ka2, (B2, action_dim), jnp.float32)
    params2 = init_params(kp2, input_dim, action_dim, fh2, sh2)
    ref2 = critic_reference(state2, action2, params2)
    packed2 = prepare_params(params2, input_dim, action_dim, fh2, sh2,
                             compute_dtype=jnp.float32)
    out2 = jax.block_until_ready(
        critic_forward(state2, action2, packed2, block_b=1024))
    assert out2.shape == (B2, 1)
    assert jnp.allclose(out2, ref2, atol=1e-4, rtol=1e-4)

    print("KERNEL_OK")
</pallas_src>

<mosaic_0001>
module attributes {stable_mosaic.version = 11 : i64} {
  func.func @critic_kernel(%arg0: i32, %arg1: memref<128x16xf32, #tpu.memory_space<vmem>>, %arg2: memref<128x4xf32, #tpu.memory_space<vmem>>, %arg3: memref<16x128xf32, #tpu.memory_space<vmem>>, %arg4: memref<128x128xf32, #tpu.memory_space<vmem>>, %arg5: memref<4x128xf32, #tpu.memory_space<vmem>>, %arg6: memref<128x128xf32, #tpu.memory_space<vmem>>, %arg7: memref<3x128xf32, #tpu.memory_space<vmem>>, %arg8: memref<1x128xf32, #tpu.memory_space<vmem>>) attributes {dimension_semantics = [#tpu.dimension_semantics<parallel>], iteration_bounds = array<i64: 1>, scalar_prefetch = 0 : i64, scratch_operands = 0 : i64, tpu.core_type = #tpu.core_type<tc>, window_params = [{transform_indices = @transform_0, window_bounds = array<i64: 128, 16>}, {transform_indices = @transform_1, window_bounds = array<i64: 128, 4>}, {pipeline_mode = #tpu.pipeline_mode<synchronous>, transform_indices = @transform_2, window_bounds = array<i64: 16, 128>}, {pipeline_mode = #tpu.pipeline_mode<synchronous>, transform_indices = @transform_3, window_bounds = array<i64: 128, 128>}, {pipeline_mode = #tpu.pipeline_mode<synchronous>, transform_indices = @transform_4, window_bounds = array<i64: 4, 128>}, {pipeline_mode = #tpu.pipeline_mode<synchronous>, transform_indices = @transform_5, window_bounds = array<i64: 128, 128>}, {pipeline_mode = #tpu.pipeline_mode<synchronous>, transform_indices = @transform_6, window_bounds = array<i64: 3, 128>}, {transform_indices = @transform_7, window_bounds = array<i64: 1, 128>}]} {
    %c0 = arith.constant 0 : index
    %c0_0 = arith.constant 0 : index
    %0 = vector.load %arg1[%c0, %c0_0] : memref<128x16xf32, #tpu.memory_space<vmem>>, vector<128x16xf32>
    %c0_1 = arith.constant 0 : index
    %c0_2 = arith.constant 0 : index
    %1 = vector.load %arg3[%c0_1, %c0_2] : memref<16x128xf32, #tpu.memory_space<vmem>>, vector<16x128xf32>
    %cst = arith.constant dense<0.000000e+00> : vector<128x128xf32>
    %2 = tpu.matmul %0, %1, %cst {dimension_numbers = #tpu.dot_dimension_numbers<[1], [0], [0], [1], [0, 0, 1, 1], [], []>} : vector<128x16xf32>, vector<16x128xf32>, vector<128x128xf32> -> vector<128x128xf32>
    %c0_3 = arith.constant 0 : index
    %c0_4 = arith.constant 0 : index
    %3 = vector.load %arg7[%c0_3, %c0_4] : memref<3x128xf32, #tpu.memory_space<vmem>>, vector<1x128xf32>
    %4 = vector.broadcast %3 : vector<1x128xf32> to vector<128x128xf32>
    %5 = arith.addf %2, %4 : vector<128x128xf32>
    %cst_5 = arith.constant 0.000000e+00 : f32
    %6 = vector.broadcast %cst_5 : f32 to vector<128x128xf32>
    %7 = arith.maximumf %5, %6 : vector<128x128xf32>
    %c0_6 = arith.constant 0 : index
    %c0_7 = arith.constant 0 : index
    %8 = vector.load %arg4[%c0_6, %c0_7] : memref<128x128xf32, #tpu.memory_space<vmem>>, vector<128x128xf32>
    %cst_8 = arith.constant dense<0.000000e+00> : vector<128x128xf32>
    %9 = tpu.matmul %7, %8, %cst_8 {dimension_numbers = #tpu.dot_dimension_numbers<[1], [0], [0], [1], [0, 0, 1, 1], [], []>} : vector<128x128xf32>, vector<128x128xf32>, vector<128x128xf32> -> vector<128x128xf32>
    %c1 = arith.constant 1 : index
    %c0_9 = arith.constant 0 : index
    %10 = vector.load %arg7[%c1, %c0_9] : memref<3x128xf32, #tpu.memory_space<vmem>>, vector<1x128xf32>
    %11 = vector.broadcast %10 : vector<1x128xf32> to vector<128x128xf32>
    %12 = arith.addf %9, %11 : vector<128x128xf32>
    %c0_10 = arith.constant 0 : index
    %c0_11 = arith.constant 0 : index
    %13 = vector.load %arg2[%c0_10, %c0_11] : memref<128x4xf32, #tpu.memory_space<vmem>>, vector<128x4xf32>
    %c0_12 = arith.constant 0 : index
    %c0_13 = arith.constant 0 : index
    %14 = vector.load %arg5[%c0_12, %c0_13] : memref<4x128xf32, #tpu.memory_space<vmem>>, vector<4x128xf32>
    %15 = vector.extract_strided_slice %13 {offsets = [0, 0], sizes = [128, 1], strides = [1, 1]} : vector<128x4xf32> to vector<128x1xf32>
    %16 = vector.extract_strided_slice %14 {offsets = [0, 0], sizes = [1, 128], strides = [1, 1]} : vector<4x128xf32> to vector<1x128xf32>
    %17 = vector.broadcast %15 : vector<128x1xf32> to vector<128x128xf32>
    %18 = vector.broadcast %16 : vector<1x128xf32> to vector<128x128xf32>
    %19 = arith.mulf %17, %18 : vector<128x128xf32>
    %20 = arith.addf %12, %19 : vector<128x128xf32>
    %21 = vector.extract_strided_slice %13 {offsets = [0, 1], sizes = [128, 1], strides = [1, 1]} : vector<128x4xf32> to vector<128x1xf32>
    %22 = vector.extract_strided_slice %14 {offsets = [1, 0], sizes = [1, 128], strides = [1, 1]} : vector<4x128xf32> to vector<1x128xf32>
    %23 = vector.broadcast %21 : vector<128x1xf32> to vector<128x128xf32>
    %24 = vector.broadcast %22 : vector<1x128xf32> to vector<128x128xf32>
    %25 = arith.mulf %23, %24 : vector<128x128xf32>
    %26 = arith.addf %20, %25 : vector<128x128xf32>
    %27 = vector.extract_strided_slice %13 {offsets = [0, 2], sizes = [128, 1], strides = [1, 1]} : vector<128x4xf32> to vector<128x1xf32>
    %28 = vector.extract_strided_slice %14 {offsets = [2, 0], sizes = [1, 128], strides = [1, 1]} : vector<4x128xf32> to vector<1x128xf32>
    %29 = vector.broadcast %27 : vector<128x1xf32> to vector<128x128xf32>
    %30 = vector.broadcast %28 : vector<1x128xf32> to vector<128x128xf32>
    %31 = arith.mulf %29, %30 : vector<128x128xf32>
    %32 = arith.addf %26, %31 : vector<128x128xf32>
    %33 = vector.extract_strided_slice %13 {offsets = [0, 3], sizes = [128, 1], strides = [1, 1]} : vector<128x4xf32> to vector<128x1xf32>
    %34 = vector.extract_strided_slice %14 {offsets = [3, 0], sizes = [1, 128], strides = [1, 1]} : vector<4x128xf32> to vector<1x128xf32>
    %35 = vector.broadcast %33 : vector<128x1xf32> to vector<128x128xf32>
    %36 = vector.broadcast %34 : vector<1x128xf32> to vector<128x128xf32>
    %37 = arith.mulf %35, %36 : vector<128x128xf32>
    %38 = arith.addf %32, %37 : vector<128x128xf32>
    %cst_14 = arith.constant 0.000000e+00 : f32
    %39 = vector.broadcast %cst_14 : f32 to vector<128x128xf32>
    %40 = arith.maximumf %38, %39 : vector<128x128xf32>
    %c0_15 = arith.constant 0 : index
    %c0_16 = arith.constant 0 : index
    %41 = vector.load %arg6[%c0_15, %c0_16] : memref<128x128xf32, #tpu.memory_space<vmem>>, vector<128x128xf32>
    %cst_17 = arith.constant dense<0.000000e+00> : vector<128x128xf32>
    %42 = tpu.matmul %40, %41, %cst_17 {dimension_numbers = #tpu.dot_dimension_numbers<[1], [0], [0], [1], [0, 0, 1, 1], [], []>} : vector<128x128xf32>, vector<128x128xf32>, vector<128x128xf32> -> vector<128x128xf32>
    %c2 = arith.constant 2 : index
    %c0_18 = arith.constant 0 : index
    %43 = vector.load %arg7[%c2, %c0_18] : memref<3x128xf32, #tpu.memory_space<vmem>>, vector<1x128xf32>
    %44 = vector.broadcast %43 : vector<1x128xf32> to vector<128x128xf32>
    %45 = arith.addf %42, %44 : vector<128x128xf32>
    %46 = tpu.transpose %45, [1, 0] : vector<128x128xf32> -> vector<128x128xf32>
    %47 = vector.extract_strided_slice %46 {offsets = [0, 0], sizes = [1, 128], strides = [1, 1]} : vector<128x128xf32> to vector<1x128xf32>
    %c0_19 = arith.constant 0 : index
    %c0_20 = arith.constant 0 : index
    %48 = vector.load %arg8[%c0_19, %c0_20] : memref<1x128xf32, #tpu.memory_space<vmem>>, vector<1x128xf32>
    tpu.vector_store %arg8[%c0_19, %c0_20], %47 {strides = array<i32>} : memref<1x128xf32, #tpu.memory_space<vmem>>, vector<1x128xf32>,
    return
  }
  func.func @transform_0(%arg0: i32) -> (i32, i32) {
    %c0_i32 = arith.constant 0 : i32
    %c0_i32_0 = arith.constant 0 : i32
    return %arg0, %c0_i32 : i32, i32
  }
  func.func @transform_1(%arg0: i32) -> (i32, i32) {
    %c0_i32 = arith.constant 0 : i32
    %c0_i32_0 = arith.constant 0 : i32
    return %arg0, %c0_i32 : i32, i32
  }
  func.func @transform_2(%arg0: i32) -> (i32, i32) {
    %c0_i32 = arith.constant 0 : i32
    %c0_i32_0 = arith.constant 0 : i32
    %c0_i32_1 = arith.constant 0 : i32
    return %c0_i32, %c0_i32_0 : i32, i32
  }
  func.func @transform_3(%arg0: i32) -> (i32, i32) {
    %c0_i32 = arith.constant 0 : i32
    %c0_i32_0 = arith.constant 0 : i32
    %c0_i32_1 = arith.constant 0 : i32
    return %c0_i32, %c0_i32_0 : i32, i32
  }
  func.func @transform_4(%arg0: i32) -> (i32, i32) {
    %c0_i32 = arith.constant 0 : i32
    %c0_i32_0 = arith.constant 0 : i32
    %c0_i32_1 = arith.constant 0 : i32
    return %c0_i32, %c0_i32_0 : i32, i32
  }
  func.func @transform_5(%arg0: i32) -> (i32, i32) {
    %c0_i32 = arith.constant 0 : i32
    %c0_i32_0 = arith.constant 0 : i32
    %c0_i32_1 = arith.constant 0 : i32
    return %c0_i32, %c0_i32_0 : i32, i32
  }
  func.func @transform_6(%arg0: i32) -> (i32, i32) {
    %c0_i32 = arith.constant 0 : i32
    %c0_i32_0 = arith.constant 0 : i32
    %c0_i32_1 = arith.constant 0 : i32
    return %c0_i32, %c0_i32_0 : i32, i32
  }
  func.func @transform_7(%arg0: i32) -> (i32, i32) {
    %c0_i32 = arith.constant 0 : i32
    %c0_i32_0 = arith.constant 0 : i32
    return %arg0, %c0_i32 : i32, i32
  }
}

</mosaic_0001>

<bundles_post_ra>
// kernel: tpu_custom_call.1
= control target key start
LH: loop header
LB: loop body
LE: loop exit
PB: predicated region body
PF: predicated region fallthrough
CT: control target
= control target key end

     0   :  { %vm50_vm0 = vcmask 130048   ;;  %v1391_v4 = vmov 1   ;;  %v1392_v6 = vmov 3   ;;  %s2072_s0 = inlined_call_operand.vmem [shape: f32[128,16], index: 0, kind: input, shape index: {}]   ;;  %s2073_s1 = inlined_call_operand.vmem [shape: f32[128,4], index: 1, kind: input, shape index: {}]   ;;  %s2074_s2 = inlined_call_operand.vmem [shape: f32[16,128], index: 2, kind: input, shape index: {}]   ;;  %s2075_s3 = inlined_call_operand.vmem [shape: f32[128,128], index: 3, kind: input, shape index: {}]   ;;  %s2076_s4 = inlined_call_operand.vmem [shape: f32[4,128], index: 4, kind: input, shape index: {}]   ;;  %s2077_s5 = inlined_call_operand.vmem [shape: f32[128,128], index: 5, kind: input, shape index: {}]   ;;  %s2078_s6 = inlined_call_operand.vmem [shape: f32[3,128], index: 6, kind: input, shape index: {}]   ;;  %s2079_s7 = inlined_call_operand.hbm [shape: f32[1,128], index: 7, kind: output, shape index: {}]  }
   0x1   :  { %v44_v0 = vld [vmem:[%s2074_s2 + $0x8] sm:$0xff]  ;;  %v43_v1 = vld [vmem:[%s2074_s2] sm:$0xff]  ;;  %1334 = vset.pattern.permute.xlu1 %v1391_v4  ;;  %v29_v5 = vld [vmem:[%s2072_s0 + $0x10] sm:$0xff]  ;;  %1338 = vset.pattern.permute.xlu0 %v1392_v6 }
   0x2   :  { %v27_v2 = vld [vmem:[%s2072_s0] sm:$0xff]  ;;  %1189 = vmatprep.subr.mxu0 %v44_v0  ;;  %v28_v3 = vld [vmem:[%s2072_s0 + $0x8] sm:$0xff]  ;;  %v30_v7 = vld [vmem:[%s2072_s0 + $0x18] sm:$0xff] }
   0x3   :  { %1193 = vmatprep.mubr.msk.f32.mxu0 %vm50_vm0, %v27_v2  ;;  %1190 = vmatpush3.msra.mxu0 %v44_v0  ;;  %v1462_v8 = vld [vmem:[%s2073_s1] sm:$0xff]  ;;  %v1467_v9 = vld [vmem:[%s2073_s1 + $0x8] sm:$0xff]  ;;  %v275_v11 = vld [vmem:[%s2075_s3 + $0x78] sm:$0xff] }
   0x4   :  { %1191 = vmatprep.subr.mxu0 %v43_v1  ;;  %v31_v10 = vld [vmem:[%s2072_s0 + $0x20] sm:$0xff]  ;;  %560 = vperm.xlu1 %1334, %v1462_v8   ;;  %v274_v12 = vld [vmem:[%s2075_s3 + $0x70] sm:$0xff]  ;;  %v32_v13 = vld [vmem:[%s2072_s0 + $0x28] sm:$0xff] }
   0x5   :  { %1192 = vmatpush3.msra.mxu0 %v43_v1  ;;  %764 = vperm.xlu0 %1338, %v1467_v9   ;;  %v273_v14 = vld [vmem:[%s2075_s3 + $0x68] sm:$0xff]  ;;  %v33_v15 = vld [vmem:[%s2072_s0 + $0x30] sm:$0xff]  ;;  %v272_v17 = vld [vmem:[%s2075_s3 + $0x60] sm:$0xff] }
   0x6   :  { %1194 = vmatmul.mubr.msk.f32.vlgmr.msra.gmra.mxu0 %vm50_vm0, %v28_v3  ;;  %1217 = vmatprep.subr.mxu1 %v275_v11  ;;  %v1495_v16 = vld [vmem:[%s2073_s1 + $0x10] sm:$0xff] }
   0x7   :  { %1196 = vmatprep.mubr.msk.f32.mxu0 %vm50_vm0, %v29_v5  ;;  %1218 = vmatpush3.msra.mxu1 %v275_v11 }
   0x8   :  { %564 = vperm.xlu1 %1334, %v1467_v9   ;;  %1219 = vmatprep.subr.mxu1 %v274_v12 }
   0x9   :  { %1220 = vmatpush3.msra.mxu1 %v274_v12  ;;  %768 = vperm.xlu0 %1338, %v1495_v16  }
   0xa   :  { %1197 = vmatmul.mubr.msk.f32.gmra.mxu0 %vm50_vm0, %v30_v7 }
   0xb   :  { %1199 = vmatprep.mubr.msk.f32.mxu0 %vm50_vm0, %v31_v10 }
   0xc   :  { %12 = vsyncpa [#allocation3], 0  ;;  %1221 = vmatprep.subr.mxu1 %v273_v14  ;;  %v34_v18 = vld [vmem:[%s2072_s0 + $0x38] sm:$0xff]  ;;  %v35_v20 = vld [vmem:[%s2072_s0 + $0x40] sm:$0xff]  ;;  %v1393_v21 = vmov 2   ;;  %v1394_v39 = vmov 0  }
   0xd   :  { %1222 = vmatpush3.msra.mxu1 %v273_v14  ;;  %v271_v19 = vld [vmem:[%s2075_s3 + $0x58] sm:$0xff]  ;;  %1335 = vset.pattern.permute.xlu1 %v1393_v21  ;;  %v270_v22 = vld [vmem:[%s2075_s3 + $0x50] sm:$0xff]  ;;  %v36_v23 = vld [vmem:[%s2072_s0 + $0x48] sm:$0xff] }
   0xe   :  { %1200 = vmatmul.mubr.msk.f32.gmra.mxu0 %vm50_vm0, %v32_v13  ;;  %1223 = vmatprep.subr.mxu1 %v272_v17  ;;  %v1525_v24 = vld [vmem:[%s2073_s1 + $0x38] sm:$0xff]  ;;  %v269_v25 = vld [vmem:[%s2075_s3 + $0x48] sm:$0xff]  ;;  %v37_v26 = vld [vmem:[%s2072_s0 + $0x50] sm:$0xff] }
   0xf   :  { %1202 = vmatprep.mubr.msk.f32.mxu0 %vm50_vm0, %v33_v15  ;;  %660 = vperm.xlu1 %1335, %v1462_v8   ;;  %v268_v27 = vld [vmem:[%s2075_s3 + $0x40] sm:$0xff]  ;;  %v38_v28 = vld [vmem:[%s2072_s0 + $0x58] sm:$0xff]  ;;  %v266_v31 = vld [vmem:[%s2075_s3 + $0x30] sm:$0xff] }
  0x10   :  { %1224 = vmatpush3.msra.mxu1 %v272_v17  ;;  %788 = vperm.xlu0 %1338, %v1525_v24   ;;  %v39_v29 = vld [vmem:[%s2072_s0 + $0x60] sm:$0xff]  ;;  %v267_v30 = vld [vmem:[%s2075_s3 + $0x38] sm:$0xff]  ;;  %v40_v32 = vld [vmem:[%s2072_s0 + $0x68] sm:$0xff] }
  0x11   :  { %1225 = vmatprep.subr.mxu1 %v271_v19  ;;  %v41_v33 = vld [vmem:[%s2072_s0 + $0x70] sm:$0xff]  ;;  %v429_v34 = vld [vmem:[%s2073_s1 + $0x18] sm:$0xff]  ;;  %v265_v35 = vld [vmem:[%s2075_s3 + $0x28] sm:$0xff] }
  0x12   :  { %1203 = vmatmul.mubr.msk.f32.gmra.mxu0 %vm50_vm0, %v34_v18  ;;  %1226 = vmatpush3.msra.mxu1 %v271_v19  ;;  %v42_v36 = vld [vmem:[%s2072_s0 + $0x78] sm:$0xff]  ;;  %v264_v37 = vld [vmem:[%s2075_s3 + $0x20] sm:$0xff]  ;;  %v431_v40 = vld [vmem:[%s2073_s1 + $0x28] sm:$0xff] }
  0x13   :  { %1205 = vmatprep.mubr.msk.f32.mxu0 %vm50_vm0, %v35_v20  ;;  %1227 = vmatprep.subr.mxu1 %v270_v22  ;;  %v430_v38 = vld [vmem:[%s2073_s1 + $0x20] sm:$0xff]  ;;  %v263_v41 = vld [vmem:[%s2075_s3 + $0x18] sm:$0xff]  ;;  %v432_v42 = vld [vmem:[%s2073_s1 + $0x30] sm:$0xff] }
  0x14   :  { %664 = vperm.xlu1 %1335, %v1467_v9   ;;  %1228 = vmatpush3.msra.mxu1 %v270_v22  ;;  %v262_v43 = vld [vmem:[%s2075_s3 + $0x10] sm:$0xff]  ;;  %v261_v44 = vld [vmem:[%s2075_s3 + $0x8] sm:$0xff]  ;;  %v434_v45 = vld [vmem:[%s2073_s1 + $0x40] sm:$0xff] }
  0x15   :  { %1229 = vmatprep.subr.mxu1 %v269_v25  ;;  %792 = vperm.xlu0 %1338, %v434_v45   ;;  %v260_v46 = vld [vmem:[%s2075_s3] sm:$0xff]  ;;  %v435_v47 = vld [vmem:[%s2073_s1 + $0x48] sm:$0xff]  ;;  %v1626_v48 = vld [vmem:[%s2073_s1 + $0x58] sm:$0xff] }
  0x16   :  { %1206 = vmatmul.mubr.msk.f32.gmra.mxu0 %vm50_vm0, %v36_v23  ;;  %1230 = vmatpush3.msra.mxu1 %v269_v25  ;;  %v1633_v49 = vld [vmem:[%s2073_s1 + $0x60] sm:$0xff]  ;;  %v436_v50 = vld [vmem:[%s2073_s1 + $0x50] sm:$0xff]  ;;  %v890_v51 = vld [vmem:[%s2077_s5 + $0x78] sm:$0xff] }
  0x17   :  { %1208 = vmatprep.mubr.msk.f32.mxu0 %vm50_vm0, %v37_v26  ;;  %1231 = vmatprep.subr.mxu1 %v268_v27  ;;  %v889_v52 = vld [vmem:[%s2077_s5 + $0x70] sm:$0xff]  ;;  %v888_v53 = vld [vmem:[%s2077_s5 + $0x68] sm:$0xff]  ;;  %v887_v54 = vld [vmem:[%s2077_s5 + $0x60] sm:$0xff] }
  0x18   :  { %1336 = vset.pattern.permute.xlu1 %v1392_v6  ;;  %1232 = vmatpush3.msra.mxu1 %v268_v27  ;;  %v886_v55 = vld [vmem:[%s2077_s5 + $0x58] sm:$0xff]  ;;  %v439_v56 = vld [vmem:[%s2073_s1 + $0x68] sm:$0xff]  ;;  %v885_v57 = vld [vmem:[%s2077_s5 + $0x50] sm:$0xff] }
  0x19   :  { %760 = vperm.xlu1 %1336, %v1462_v8   ;;  %1233 = vmatprep.subr.mxu1 %v267_v30  ;;  %v884_v58 = vld [vmem:[%s2077_s5 + $0x48] sm:$0xff]  ;;  %v440_v59 = vld [vmem:[%s2073_s1 + $0x70] sm:$0xff]  ;;  %v883_v60 = vld [vmem:[%s2077_s5 + $0x40] sm:$0xff] }
  0x1a   :  { %1209 = vmatmul.mubr.msk.f32.gmra.mxu0 %vm50_vm0, %v38_v28  ;;  %1234 = vmatpush3.msra.mxu1 %v267_v30  ;;  %v882_v61 = vld [vmem:[%s2077_s5 + $0x38] sm:$0xff]  ;;  %v1707_v1 = vld [vmem:[%s2078_s6] ss:$0 sm:$0xff] }
  0x1b   :  { %1211 = vmatprep.mubr.msk.f32.mxu0 %vm50_vm0, %v39_v29  ;;  %1235 = vmatprep.subr.mxu1 %v266_v31  ;;  %v441_v62 = vld [vmem:[%s2073_s1 + $0x78] sm:$0xff] }
  0x1c   :  { %1236 = vmatpush3.msra.mxu1 %v266_v31  ;;  %1354 = vset.pattern.permute.xlu0 %v1394_v39 }
  0x1d   :  { %1337 = vset.pattern.permute.xlu1 %v1391_v4  ;;  %1237 = vmatprep.subr.mxu1 %v265_v35 }
  0x1e   :  { %1212 = vmatmul.mubr.msk.f32.gmra.mxu0 %vm50_vm0, %v40_v32  ;;  %572 = vperm.xlu1 %1337, %v429_v34  }
  0x1f   :  { %1214 = vmatprep.mubr.msk.f32.mxu0 %vm50_vm0, %v41_v33  ;;  %1238 = vmatpush3.msra.mxu1 %v265_v35 }
  0x20   :  { %1239 = vmatprep.subr.mxu1 %v264_v37  ;;  %445 = vperm.xlu0 %1354, %v1462_v8  }
  0x21   :  { %1240 = vmatpush3.msra.mxu1 %v264_v37  ;;  %1273 = vmatprep.subr.mxu0 %v890_v51 }
  0x22   :  { %1215 = vmatmul.mubr.msk.f32.gmra.mxu0 %vm50_vm0, %v42_v36  ;;  %1339 = vset.pattern.permute.xlu1 %v1394_v39 }
  0x23   :  { %465 = vperm.xlu1 %1339, %v430_v38   ;;  %1241 = vmatprep.subr.mxu1 %v263_v41 }
  0x24   :  { %1242 = vmatpush3.msra.mxu1 %v263_v41  ;;  %450 = vperm.xlu0 %1354, %v1467_v9  }
  0x25   :  { %1243 = vmatprep.subr.mxu1 %v262_v43  ;;  %1274 = vmatpush3.msra.mxu0 %v890_v51 }
  0x26   :  { %1244 = vmatpush3.msra.mxu1 %v262_v43  ;;  %1275 = vmatprep.subr.mxu0 %v889_v52 }
  0x27   :  { %1340 = vset.pattern.permute.xlu1 %v1393_v21  ;;  %1245 = vmatprep.subr.mxu1 %v261_v44 }
  0x28   :  { %668 = vperm.xlu1 %1340, %v1495_v16   ;;  %1246 = vmatpush3.msra.mxu1 %v261_v44 }
  0x29   :  { %1247 = vmatprep.subr.mxu1 %v260_v46  ;;  %455 = vperm.xlu0 %1354, %v1495_v16  }
  0x2a   :  { %1248 = vmatpush3.msra.mxu1 %v260_v46  ;;  %1276 = vmatpush3.msra.mxu0 %v889_v52 }
  0x2b   :  { %1277 = vmatprep.subr.mxu0 %v888_v53 }
  0x2c   :  { %672 = vperm.xlu1 %1340, %v429_v34   ;;  %1278 = vmatpush3.msra.mxu0 %v888_v53 }
  0x2d   :  { %460 = vperm.xlu0 %1354, %v429_v34   ;;  %1279 = vmatprep.subr.mxu0 %v887_v54 }
  0x2e   :  { %1280 = vmatpush3.msra.mxu0 %v887_v54 }
  0x2f   :  { %1281 = vmatprep.subr.mxu0 %v886_v55 }
  0x30   :  { %1341 = vset.pattern.permute.xlu1 %v1391_v4  ;;  %1282 = vmatpush3.msra.mxu0 %v886_v55 }
  0x31   :  { %576 = vperm.xlu1 %1341, %v430_v38   ;;  %470 = vperm.xlu0 %1354, %v431_v40  }
  0x32   :  { %1283 = vmatprep.subr.mxu0 %v885_v57 }
  0x33   :  { %1284 = vmatpush3.msra.mxu0 %v885_v57 }
  0x34   :  { %1285 = vmatprep.subr.mxu0 %v884_v58 }
  0x35   :  { %580 = vperm.xlu1 %1341, %v431_v40   ;;  %475 = vperm.xlu0 %1354, %v432_v42  }
  0x36   :  { %1286 = vmatpush3.msra.mxu0 %v884_v58 }
  0x37   :  { %1287 = vmatprep.subr.mxu0 %v883_v60 }
  0x38   :  { %1288 = vmatpush3.msra.mxu0 %v883_v60 }
  0x39   :  { %1342 = vset.pattern.permute.xlu1 %v1392_v6  ;;  %500 = vperm.xlu0 %1354, %v1626_v48  }
  0x3a   :  { %772 = vperm.xlu1 %1342, %v429_v34   ;;  %1289 = vmatprep.subr.mxu0 %v882_v61 }
  0x3b   :  { %1290 = vmatpush3.msra.mxu0 %v882_v61 }
  0x3d   :  { %505 = vperm.xlu0 %1354, %v1633_v49  }
  0x3e   :  { %1343 = vset.pattern.permute.xlu1 %v1393_v21 }
  0x3f   :  { %676 = vperm.xlu1 %1343, %v430_v38  }
  0x41   :  { %1356 = vset.pattern.permute.xlu0 %v1393_v21 }
  0x42   :  { %680 = vperm.xlu0 %1356, %v431_v40  }
  0x43   :  { %1344 = vset.pattern.permute.xlu1 %v1394_v39 }
  0x44   :  { %480 = vperm.xlu1 %1344, %v1525_v24  }
  0x46   :  { %684 = vperm.xlu0 %1356, %v432_v42  }
  0x48   :  { %1345 = vset.pattern.permute.xlu1 %v1391_v4 }
  0x49   :  { %584 = vperm.xlu1 %1345, %v432_v42  }
  0x4a   :  { %704 = vperm.xlu0 %1356, %v1626_v48  }
  0x4d   :  { %1346 = vset.pattern.permute.xlu1 %v1392_v6 }
  0x4e   :  { %776 = vperm.xlu1 %1346, %v430_v38   ;;  %708 = vperm.xlu0 %1356, %v1633_v49  }
  0x52   :  { %780 = vperm.xlu1 %1346, %v431_v40   ;;  %1362 = vset.pattern.permute.xlu0 %v1391_v4 }
  0x53   :  { %568 = vperm.xlu0 %1362, %v1495_v16  }
  0x56   :  { %1347 = vset.pattern.permute.xlu1 %v1394_v39 }
  0x57   :  { %485 = vperm.xlu1 %1347, %v434_v45   ;;  %588 = vperm.xlu0 %1362, %v1525_v24  }
  0x5b   :  { %490 = vperm.xlu1 %1347, %v435_v47   ;;  %592 = vperm.xlu0 %1362, %v434_v45  }
  0x5f   :  { %1348 = vset.pattern.permute.xlu1 %v1393_v21  ;;  %612 = vperm.xlu0 %1362, %v439_v56  }
  0x60   :  { %688 = vperm.xlu1 %1348, %v1525_v24  }
  0x63   :  { %616 = vperm.xlu0 %1362, %v440_v59  }
  0x64   :  { %1349 = vset.pattern.permute.xlu1 %v1392_v6 }
  0x65   :  { %784 = vperm.xlu1 %1349, %v432_v42  }
  0x67   :  { %1366 = vset.pattern.permute.xlu0 %v1392_v6 }
  0x68   :  { %812 = vperm.xlu0 %1366, %v439_v56  }
  0x69   :  { %1350 = vset.pattern.permute.xlu1 %v1391_v4 }
  0x6a   :  { %596 = vperm.xlu1 %1350, %v435_v47  }
  0x6c   :  { %816 = vperm.xlu0 %1366, %v440_v59  }
  0x6e   :  { %1351 = vset.pattern.permute.xlu1 %v1394_v39 }
  0x6f   :  { %495 = vperm.xlu1 %1351, %v436_v50  }
  0x73   :  { %1352 = vset.pattern.permute.xlu1 %v1393_v21 }
  0x74   :  { %692 = vperm.xlu1 %1352, %v434_v45  }
  0x78   :  { %696 = vperm.xlu1 %1352, %v435_v47  }
  0x7c   :  { %1353 = vset.pattern.permute.xlu1 %v1391_v4 }
  0x7d   :  { %600 = vperm.xlu1 %1353, %v436_v50  }
  0x7f   :  { %v1699_v63 = vpop.permute.xlu1 %560 }
  0x81   :  { %604 = vperm.xlu1 %1353, %v1626_v48  }
  0x83   :  { %v1701_v0 = vpop.permute.xlu1 %564 }
  0x85   :  { %1355 = vset.pattern.permute.xlu1 %v1392_v6 }
  0x86   :  { %796 = vperm.xlu1 %1355, %v435_v47  }
  0x8a   :  { %1357 = vset.pattern.permute.xlu1 %v1393_v21  ;;  %v1711_v8 = vpop.permute.xlu1 %660 }
  0x8b   :  { %700 = vperm.xlu1 %1357, %v436_v50  }
  0x8f   :  { %1358 = vset.pattern.permute.xlu1 %v1394_v39  ;;  %v1716_v18 = vpop.permute.xlu1 %664 }
  0x90   :  { %510 = vperm.xlu1 %1358, %v439_v56  }
  0x94   :  { %1359 = vset.pattern.permute.xlu1 %v1391_v4  ;;  %v1720_v25 = vpop.permute.xlu1 %760 }
  0x95   :  { %608 = vperm.xlu1 %1359, %v1633_v49  }
  0x99   :  { %1360 = vset.pattern.permute.xlu1 %v1392_v6  ;;  %v1725_v35 = vpop.permute.xlu1 %572 }
  0x9a   :  { %800 = vperm.xlu1 %1360, %v436_v50  }
  0x9e   :  { %804 = vperm.xlu1 %1360, %v1626_v48   ;;  %v1730_v45 = vpop.permute.xlu1 %465 }
  0xa2   :  { %1361 = vset.pattern.permute.xlu1 %v1394_v39 }
  0xa3   :  { %515 = vperm.xlu1 %1361, %v440_v59   ;;  %v1735_v54 = vpop.permute.xlu1 %668 }
  0xa7   :  { %520 = vperm.xlu1 %1361, %v441_v62  }
  0xab   :  { %1363 = vset.pattern.permute.xlu1 %v1393_v21 }
  0xac   :  { %712 = vperm.xlu1 %1363, %v439_v56   ;;  %v1737_v56 = vpop.permute.xlu1 %672 }
  0xb0   :  { %1364 = vset.pattern.permute.xlu1 %v1392_v6  ;;  %v1739_v57 = vpop.permute.xlu1 %576 }
  0xb1   :  { %808 = vperm.xlu1 %1364, %v1633_v49  }
  0xb4   :  { %v1741_v58 = vpop.permute.xlu1 %580 }
  0xb5   :  { %1365 = vset.pattern.permute.xlu1 %v1391_v4 }
  0xb6   :  { %620 = vperm.xlu1 %1365, %v441_v62  }
  0xba   :  { %1367 = vset.pattern.permute.xlu1 %v1393_v21 }
  0xbb   :  { %716 = vperm.xlu1 %1367, %v440_v59   ;;  %v1743_v59 = vpop.permute.xlu1 %772 }
  0xbf   :  { %720 = vperm.xlu1 %1367, %v441_v62   ;;  %v1745_v60 = vpop.permute.xlu1 %676 }
  0xc3   :  { %1368 = vset.pattern.permute.xlu1 %v1392_v6  ;;  %v1747_v61 = vpop.permute.xlu1 %480 }
  0xc4   :  { %820 = vperm.xlu1 %1368, %v441_v62   ;;  %v881_v62 = vld [vmem:[%s2077_s5 + $0x30] sm:$0xff] }
  0xc5   :  { %1291 = vmatprep.subr.mxu0 %v881_v62 }
  0xc6   :  { %v1195_v2 = vpop.f32.mrf.mxu0  ;;  %1292 = vmatpush3.msra.mxu0 %v881_v62 }
  0xc7   :  { %v171_v3 = vadd.f32 %v1195_v2, %v1707_v1  ;;  %v880_v2 = vld [vmem:[%s2077_s5 + $0x28] sm:$0xff] }
  0xc8   :  { %v165_v4 = vpop.f32.mrf.mxu0  ;;  %1293 = vmatprep.subr.mxu0 %v880_v2 }
  0xc9   :  { %v166_v5 = vadd.f32 %v1707_v1, %v165_v4  ;;  %v245_v11 = vmax.f32 %v171_v3, 0.0  ;;  %1294 = vmatpush3.msra.mxu0 %v880_v2  ;;  %v879_v3 = vld [vmem:[%s2077_s5 + $0x20] sm:$0xff]  ;;  %v878_v4 = vld [vmem:[%s2077_s5 + $0x18] sm:$0xff] }
  0xca   :  { %v1198_v7 = vpop.f32.mrf.mxu0  ;;  %1295 = vmatprep.subr.mxu0 %v879_v3 }
  0xcb   :  { %v181_v9 = vadd.f32 %v1198_v7, %v1707_v1  ;;  %v244_v10 = vmax.f32 %v166_v5, 0.0  ;;  %1296 = vmatpush3.msra.mxu0 %v879_v3  ;;  %v877_v7 = vld [vmem:[%s2077_s5 + $0x10] sm:$0xff] }
  0xcc   :  { %v175_v6 = vpop.f32.mrf.mxu0  ;;  %1297 = vmatprep.subr.mxu0 %v878_v4 }
  0xcd   :  { %v176_v12 = vadd.f32 %v1707_v1, %v175_v6  ;;  %1249 = vmatprep.mubr.f32.mxu1 %v244_v10  ;;  %v247_v13 = vmax.f32 %v181_v9, 0.0  ;;  %1298 = vmatpush3.msra.mxu0 %v878_v4  ;;  %v876_v9 = vld [vmem:[%s2077_s5 + $0x8] sm:$0xff]  ;;  %v875_v10 = vld [vmem:[%s2077_s5] sm:$0xff] }
  0xce   :  { %v1201_v14 = vpop.f32.mrf.mxu0  ;;  %1250 = vmatmul.mubr.f32.vlgmr.msra.gmra.mxu1 %v245_v11  ;;  %1299 = vmatprep.subr.mxu0 %v877_v7 }
  0xcf   :  { %v246_v15 = vmax.f32 %v176_v12, 0.0  ;;  %v191_v16 = vadd.f32 %v1201_v14, %v1707_v1  ;;  %1300 = vmatpush3.msra.mxu0 %v877_v7 }
  0xd0   :  { %v185_v17 = vpop.f32.mrf.mxu0  ;;  %1301 = vmatprep.subr.mxu0 %v876_v9 }
  0xd1   :  { %v186_v19 = vadd.f32 %v1707_v1, %v185_v17  ;;  %1252 = vmatprep.mubr.f32.mxu1 %v246_v15  ;;  %v249_v20 = vmax.f32 %v191_v16, 0.0  ;;  %1302 = vmatpush3.msra.mxu0 %v876_v9 }
  0xd2   :  { %v1204_v21 = vpop.f32.mrf.mxu0  ;;  %1253 = vmatmul.mubr.f32.gmra.mxu1 %v247_v13  ;;  %1303 = vmatprep.subr.mxu0 %v875_v10  ;;  %v765_v13 = vpop.permute.xlu0 %764 }
  0xd3   :  { %v248_v22 = vmax.f32 %v186_v19, 0.0  ;;  %v201_v23 = vadd.f32 %v1204_v21, %v1707_v1  ;;  %1304 = vmatpush3.msra.mxu0 %v875_v10 }
  0xd4   :  { %v195_v24 = vpop.f32.mrf.mxu0 }
  0xd5   :  { %v196_v26 = vadd.f32 %v1707_v1, %v195_v24  ;;  %1255 = vmatprep.mubr.f32.mxu1 %v248_v22  ;;  %v251_v27 = vmax.f32 %v201_v23, 0.0 }
  0xd6   :  { %v1207_v28 = vpop.f32.mrf.mxu0  ;;  %1256 = vmatmul.mubr.f32.gmra.mxu1 %v249_v20  ;;  %v769_v15 = vpop.permute.xlu0 %768 }
  0xd7   :  { %v250_v29 = vmax.f32 %v196_v26, 0.0  ;;  %v211_v30 = vadd.f32 %v1207_v28, %v1707_v1 }
  0xd8   :  { %v205_v31 = vpop.f32.mrf.mxu0 }
  0xd9   :  { %v206_v32 = vadd.f32 %v1707_v1, %v205_v31  ;;  %1258 = vmatprep.mubr.f32.mxu1 %v250_v29  ;;  %v253_v33 = vmax.f32 %v211_v30, 0.0 }
  0xda   :  { %v1210_v34 = vpop.f32.mrf.mxu0  ;;  %1259 = vmatmul.mubr.f32.gmra.mxu1 %v251_v27  ;;  %v789_v17 = vpop.permute.xlu0 %788 }
  0xdb   :  { %v252_v36 = vmax.f32 %v206_v32, 0.0  ;;  %v221_v37 = vadd.f32 %v1210_v34, %v1707_v1 }
  0xdc   :  { %v215_v38 = vpop.f32.mrf.mxu0 }
  0xdd   :  { %v216_v39 = vadd.f32 %v1707_v1, %v215_v38  ;;  %1261 = vmatprep.mubr.f32.mxu1 %v252_v36  ;;  %v255_v40 = vmax.f32 %v221_v37, 0.0 }
  0xde   :  { %v1213_v41 = vpop.f32.mrf.mxu0  ;;  %1262 = vmatmul.mubr.f32.gmra.mxu1 %v253_v33  ;;  %v793_v20 = vpop.permute.xlu0 %792 }
  0xdf   :  { %v254_v42 = vmax.f32 %v216_v39, 0.0  ;;  %v231_v43 = vadd.f32 %v1213_v41, %v1707_v1 }
  0xe0   :  { %v225_v44 = vpop.f32.mrf.mxu0 }
  0xe1   :  { %v226_v46 = vadd.f32 %v1707_v1, %v225_v44  ;;  %1264 = vmatprep.mubr.f32.mxu1 %v254_v42  ;;  %v257_v47 = vmax.f32 %v231_v43, 0.0  ;;  %v523_v43 = vlaneseq }
  0xe2   :  { %v1216_v48 = vpop.f32.mrf.mxu0  ;;  %1265 = vmatmul.mubr.f32.gmra.mxu1 %v255_v40  ;;  %v446_v22 = vpop.permute.xlu0 %445 }
  0xe3   :  { %v256_v49 = vmax.f32 %v226_v46, 0.0  ;;  %v241_v50 = vadd.f32 %v1216_v48, %v1707_v1  ;;  %v524_v46 = vshrl.u32 %v523_v43, 7 }
  0xe4   :  { %v235_v51 = vpop.f32.mrf.mxu0 }
  0xe5   :  { %v236_v52 = vadd.f32 %v1707_v1, %v235_v51  ;;  %1267 = vmatprep.mubr.f32.mxu1 %v256_v49  ;;  %v259_v53 = vmax.f32 %v241_v50, 0.0  ;;  %v1752_v1 = vpop.permute.xlu1 %584  ;;  %v625_v49 = vsub.s32 1, %v524_v46  ;;  %v442_v50 = vld [vmem:[%s2076_s4] sm:$0xf]  ;;  %v725_v51 = vsub.s32 2, %v524_v46 }
  0xe6   :  { %1268 = vmatmul.mubr.f32.gmra.mxu1 %v257_v47  ;;  %v451_v24 = vpop.permute.xlu0 %450 }
  0xe7   :  { %v258_v55 = vmax.f32 %v236_v52, 0.0  ;;  %v825_v52 = vsub.s32 3, %v524_v46  ;;  %v1831_v62 = vrot.slane %v442_v50, %v625_v49  ;;  %v1833_v2 = vrot.slane %v442_v50, %v725_v51 }
  0xe9   :  { %1270 = vmatprep.mubr.f32.mxu1 %v258_v55  ;;  %v1763_v5 = vpop.permute.xlu1 %776  ;;  %v1837_v4 = vrot.slane %v442_v50, %v825_v52  ;;  %v627_v9 = vmul.f32 %v1831_v62, %v1699_v63  ;;  %v628_v10 = vmul.f32 %v1831_v62, %v1701_v0  ;;  %v727_v49 = vmul.f32 %v1833_v2, %v1711_v8  ;;  %v1859_v63 = vld [vmem:[%s2078_s6 + $0x1] ss:$0 sm:$0xff] }
  0xea   :  { %1271 = vmatmul.mubr.f32.gmra.mxu1 %v259_v53  ;;  %v456_v27 = vpop.permute.xlu0 %455  ;;  %v525_v53 = vsub.s32 0, %v524_v46  ;;  %v728_v51 = vmul.f32 %v1833_v2, %v1716_v18  ;;  %v630_v8 = vmul.f32 %v1831_v62, %v1725_v35 }
  0xeb   :  { %v828_v43 = vmul.f32 %v1837_v4, %v765_v13  ;;  %v1851_v52 = vmul.f32 %v1837_v4, %v769_v15  ;;  %v1863_v0 = vmul.f32 %v1837_v4, %v1720_v25  ;;  %v1873_v13 = vmul.f32 %v1833_v2, %v1735_v54 }
  0xec   :  { %v1839_v7 = vrot.slane %v442_v50, %v525_v53  ;;  %v1854_v50 = vmul.f32 %v1837_v4, %v789_v17  ;;  %v730_v15 = vmul.f32 %v1833_v2, %v1737_v56  ;;  %v1879_v17 = vmul.f32 %v1831_v62, %v1739_v57 }
  0xed   :  { %v1774_v11 = vpop.permute.xlu1 %780  ;;  %v632_v25 = vmul.f32 %v1831_v62, %v1741_v58  ;;  %v1885_v35 = vmul.f32 %v1837_v4, %v1743_v59  ;;  %v1891_v54 = vmul.f32 %v1833_v2, %v1745_v60  ;;  %v1900_v58 = vmul.f32 %v1837_v4, %v793_v20 }
  0xee   :  { %v1794_v29 = vpop.permute.xlu0 %460  ;;  %2083 = vst [vmem:[#allocation8_spill] sm:$0xff] %v1854_v50  ;;  %v1869_v18 = vmul.f32 %v1839_v7, %v1730_v45  ;;  %v1895_v56 = vmul.f32 %v1839_v7, %v1747_v61  ;;  %v528_v57 = vmul.f32 %v1839_v7, %v451_v24  ;;  %v1904_v59 = vmul.f32 %v1831_v62, %v1752_v1 }
  0xef   :  { %2085 = vst [vmem:[#allocation10_spill] sm:$0xff] %v1900_v58  ;;  %v1909_v60 = vmul.f32 %v1837_v4, %v1763_v5  ;;  %v1913_v61 = vmul.f32 %v1837_v4, %v1774_v11  ;;  %v529_v24 = vmul.f32 %v1839_v7, %v456_v27 }
  0xf1   :  { %v1776_v6 = vpop.permute.xlu1 %485 }
  0xf2   :  { %v1798_v31 = vpop.permute.xlu0 %470  ;;  %v1919_v1 = vmul.f32 %v1839_v7, %v1776_v6 }
  0xf3   :  { %v532_v11 = vmul.f32 %v1839_v7, %v1798_v31 }
  0xf5   :  { %v1778_v12 = vpop.permute.xlu1 %490 }
  0xf6   :  { %v1802_v33 = vpop.permute.xlu0 %475  ;;  %v1925_v5 = vmul.f32 %v1839_v7, %v1778_v12 }
  0xf9   :  { %v1780_v14 = vpop.permute.xlu1 %688 }
  0xfa   :  { %v1806_v36 = vpop.permute.xlu0 %500  ;;  %v1931_v27 = vmul.f32 %v1833_v2, %v1780_v14 }
  0xfb   :  { %v1942_v12 = vmul.f32 %v1839_v7, %v1806_v36 }
  0xfd   :  { %v1782_v16 = vpop.permute.xlu1 %784 }
  0xfe   :  { %v1810_v38 = vpop.permute.xlu0 %505 }
 0x101   :  { %v1784_v19 = vpop.permute.xlu1 %596 }
 0x102   :  { %v1814_v40 = vpop.permute.xlu0 %680 }
 0x105   :  { %v1786_v21 = vpop.permute.xlu1 %495 }
 0x106   :  { %v1818_v42 = vpop.permute.xlu0 %684  ;;  %v1958_v36 = vmul.f32 %v1839_v7, %v1786_v21 }
 0x107   :  { %v733_v21 = vmul.f32 %v1833_v2, %v1818_v42 }
 0x109   :  { %v1788_v23 = vpop.permute.xlu1 %692 }
 0x10a   :  { %v1822_v47 = vpop.permute.xlu0 %704 }
 0x10d   :  { %v1790_v26 = vpop.permute.xlu1 %696 }
 0x10e   :  { %v1829_v55 = vpop.permute.xlu0 %708 }
 0x111   :  { %v1792_v28 = vpop.permute.xlu1 %600 }
 0x112   :  { %v569_v46 = vpop.permute.xlu0 %568 }
 0x113   :  { %v629_v31 = vmul.f32 %v1831_v62, %v569_v46  ;;  %v732_v46 = vmul.f32 %v1833_v2, %v1814_v40 }
 0x115   :  { %v1796_v30 = vpop.permute.xlu1 %604 }
 0x119   :  { %v1800_v32 = vpop.permute.xlu1 %796 }
 0x11d   :  { %v1804_v34 = vpop.permute.xlu1 %700 }
 0x121   :  { %v1808_v37 = vpop.permute.xlu1 %510 }
 0x125   :  { %v1812_v39 = vpop.permute.xlu1 %608 }
 0x129   :  { %v1816_v41 = vpop.permute.xlu1 %800 }
 0x12d   :  { %v1820_v44 = vpop.permute.xlu1 %804 }
 0x12e   :  { %2080 = vst [vmem:[#allocation5_spill] sm:$0xff] %v1820_v44 }
 0x131   :  { %v1824_v48 = vpop.permute.xlu1 %515 }
 0x132   :  { %2081 = vst [vmem:[#allocation6_spill] sm:$0xff] %v1824_v48 }
 0x135   :  { %v1835_v3 = vpop.permute.xlu1 %520 }
 0x136   :  { %2082 = vst [vmem:[#allocation7_spill] sm:$0xff] %v1835_v3 }
 0x139   :  { %v1887_v53 = vpop.permute.xlu1 %712 }
 0x13a   :  { %2084 = vst [vmem:[#allocation9_spill] sm:$0xff] %v1887_v53  ;;  %v527_v53 = vmul.f32 %v1839_v7, %v446_v22  ;;  %v530_v22 = vmul.f32 %v1839_v7, %v1794_v29  ;;  %v1938_v29 = vmul.f32 %v1837_v4, %v1782_v16  ;;  %v1954_v16 = vmul.f32 %v1839_v7, %v1810_v38 }
 0x13b   :  { %v1969_v38 = vmul.f32 %v1833_v2, %v1790_v26  ;;  %v1984_v26 = vmul.f32 %v1833_v2, %v1829_v55 }
 0x13d   :  { %v1945_v14 = vpop.permute.xlu1 %808 }
 0x18e   :  { %v1251_v45 = vpop.f32.mrf.mxu1 }
 0x18f   :  { %v353_v3 = vadd.f32 %v1251_v45, %v1859_v63  ;;  %v589_v45 = vpop.permute.xlu0 %588 }
 0x190   :  { %v347_v48 = vpop.f32.mrf.mxu1 }
 0x191   :  { %v544_v20 = vadd.f32 %v528_v57, %v353_v3  ;;  %v348_v58 = vadd.f32 %v1859_v63, %v347_v48  ;;  %v533_v57 = vmul.f32 %v1839_v7, %v1802_v33  ;;  %v1950_v33 = vmul.f32 %v1831_v62, %v1784_v19 }
 0x192   :  { %v1254_v44 = vpop.f32.mrf.mxu1  ;;  %v1965_v19 = vmul.f32 %v1833_v2, %v1788_v23  ;;  %v1980_v23 = vmul.f32 %v1831_v62, %v1792_v28  ;;  %v634_v28 = vmul.f32 %v1831_v62, %v589_v45  ;;  %v2004_v45 = vmul.f32 %v1833_v2, %v1804_v34 }
 0x193   :  { %v644_v48 = vadd.f32 %v628_v10, %v544_v20  ;;  %v543_v3 = vadd.f32 %v527_v53, %v348_v58  ;;  %v363_v6 = vadd.f32 %v1254_v44, %v1859_v63  ;;  %v593_v20 = vpop.permute.xlu0 %592 }
 0x194   :  { %v357_v50 = vpop.f32.mrf.mxu1 }
 0x195   :  { %v744_v10 = vadd.f32 %v728_v51, %v644_v48  ;;  %v643_v53 = vadd.f32 %v627_v9, %v543_v3  ;;  %v546_v58 = vadd.f32 %v530_v22, %v363_v6  ;;  %v358_v44 = vadd.f32 %v1859_v63, %v357_v50 }
 0x196   :  { %v1257_v51 = vpop.f32.mrf.mxu1 }
 0x197   :  { %v844_v9 = vadd.f32 %v828_v43, %v744_v10  ;;  %v646_v22 = vadd.f32 %v630_v8, %v546_v58  ;;  %v545_v50 = vadd.f32 %v529_v24, %v358_v44  ;;  %v373_v48 = vadd.f32 %v1257_v51, %v1859_v63 }
 0x198   :  { %v367_v3 = vpop.f32.mrf.mxu1  ;;  %v743_v40 = vadd.f32 %v727_v49, %v643_v53  ;;  %v1975_v43 = vmul.f32 %v1833_v2, %v1822_v47  ;;  %v1987_v53 = vpop.permute.xlu1 %620 }
 0x199   :  { %v645_v8 = vadd.f32 %v629_v31, %v545_v50  ;;  %v548_v24 = vadd.f32 %v532_v11, %v373_v48  ;;  %v368_v6 = vadd.f32 %v1859_v63, %v367_v3  ;;  %v746_v49 = vadd.f32 %v730_v15, %v646_v22  ;;  %v613_v48 = vpop.permute.xlu0 %612 }
 0x19a   :  { %v1260_v10 = vpop.f32.mrf.mxu1  ;;  %v843_v42 = vadd.f32 %v1863_v0, %v743_v40  ;;  %v860_v44 = vmax.f32 %v844_v9, 0.0  ;;  %v638_v22 = vmul.f32 %v1831_v62, %v1796_v30 }
 0x19b   :  { %v648_v47 = vadd.f32 %v632_v25, %v548_v24  ;;  %v547_v31 = vadd.f32 %v1869_v18, %v368_v6  ;;  %v383_v11 = vadd.f32 %v1260_v10, %v1859_v63  ;;  %v745_v58 = vadd.f32 %v1873_v13, %v645_v8 }
 0x19c   :  { %v377_v51 = vpop.f32.mrf.mxu1  ;;  %v859_v50 = vmax.f32 %v843_v42, 0.0  ;;  %v846_v55 = vadd.f32 %v1885_v35, %v746_v49  ;;  %v836_v13 = vmul.f32 %v1837_v4, %v1800_v32  ;;  %v2011_v34 = vpop.permute.xlu1 %716  ;;  %v2021_v42 = vmul.f32 %v1837_v4, %v1816_v41 }
 0x19d   :  { %v647_v0 = vadd.f32 %v1879_v17, %v547_v31  ;;  %v550_v15 = vadd.f32 %v1895_v56, %v383_v11  ;;  %v378_v25 = vadd.f32 %v1859_v63, %v377_v51  ;;  %v845_v18 = vadd.f32 %v1851_v52, %v745_v58 }
 0x19e   :  { %1305 = vmatprep.mubr.f32.mxu0 %v859_v50  ;;  %v1263_v35 = vpop.f32.mrf.mxu1  ;;  %v748_v9 = vadd.f32 %v732_v46, %v648_v47  ;;  %v540_v52 = vmul.f32 %v1839_v7, %v1808_v37  ;;  %v862_v8 = vmax.f32 %v846_v55, 0.0  ;;  %v639_v37 = vmul.f32 %v1831_v62, %v1812_v39  ;;  %v2087_v50 = vld [vmem:[#allocation5_spill] sm:$0xff]  ;;  %v2088_v55 = vld [vmem:[#allocation6_spill] sm:$0xff] }
 0x19f   :  { %v650_v17 = vadd.f32 %v634_v28, %v550_v15  ;;  %v549_v3 = vadd.f32 %v533_v57, %v378_v25  ;;  %v393_v56 = vadd.f32 %v1263_v35, %v1859_v63  ;;  %1306 = vmatmul.mubr.f32.vlgmr.msra.gmra.mxu0 %v860_v44  ;;  %v861_v40 = vmax.f32 %v845_v18, 0.0  ;;  %v2086_v28 = vld [vmem:[#allocation8_spill] sm:$0xff] }
 0x1a0   :  { %v387_v30 = vpop.f32.mrf.mxu1  ;;  %v747_v32 = vadd.f32 %v1891_v54, %v647_v0  ;;  %v848_v24 = vadd.f32 %v1913_v61, %v748_v9  ;;  %v635_v54 = vmul.f32 %v1831_v62, %v593_v20  ;;  %v640_v39 = vmul.f32 %v1831_v62, %v613_v48  ;;  %v2089_v0 = vld [vmem:[#allocation7_spill] sm:$0xff]  ;;  %v721_v18 = vpop.permute.xlu1 %720 }
 0x1a1   :  { %v649_v6 = vadd.f32 %v1904_v59, %v549_v3  ;;  %v552_v46 = vadd.f32 %v1925_v5, %v393_v56  ;;  %v388_v57 = vadd.f32 %v1859_v63, %v387_v30  ;;  %1308 = vmatprep.mubr.f32.mxu0 %v861_v40  ;;  %v750_v10 = vadd.f32 %v1931_v27, %v650_v17  ;;  %v617_v59 = vpop.permute.xlu0 %616  ;;  %v2090_v3 = vld [vmem:[#allocation9_spill] sm:$0xff] }
 0x1a2   :  { %v1266_v61 = vpop.f32.mrf.mxu1  ;;  %v847_v49 = vadd.f32 %v1909_v60, %v747_v32  ;;  %v864_v41 = vmax.f32 %v848_v24, 0.0  ;;  %v542_v48 = vmul.f32 %v1839_v7, %v2089_v0  ;;  %v740_v56 = vmul.f32 %v1833_v2, %v2090_v3 }
 0x1a3   :  { %v652_v5 = vadd.f32 %v1950_v33, %v552_v46  ;;  %v551_v47 = vadd.f32 %v1919_v1, %v388_v57  ;;  %v403_v31 = vadd.f32 %v1266_v61, %v1859_v63  ;;  %1309 = vmatmul.mubr.f32.gmra.mxu0 %v862_v8  ;;  %v749_v27 = vadd.f32 %v733_v21, %v649_v6 }
 0x1a4   :  { %v397_v11 = vpop.f32.mrf.mxu1  ;;  %v863_v58 = vmax.f32 %v847_v49, 0.0  ;;  %v850_v44 = vadd.f32 %v2086_v28, %v750_v10  ;;  %v838_v1 = vmul.f32 %v1837_v4, %v2087_v50  ;;  %v541_v21 = vmul.f32 %v1839_v7, %v2088_v55  ;;  %v2091_v10 = vld [vmem:[#allocation10_spill] sm:$0xff] }
 0x1a5   :  { %v651_v20 = vadd.f32 %v635_v54, %v551_v47  ;;  %v554_v51 = vadd.f32 %v1942_v12, %v403_v31  ;;  %v398_v60 = vadd.f32 %v1859_v63, %v397_v11  ;;  %v849_v33 = vadd.f32 %v1938_v29, %v749_v27  ;;  %v813_v17 = vpop.permute.xlu0 %812 }
 0x1a6   :  { %1311 = vmatprep.mubr.f32.mxu0 %v863_v58  ;;  %v1269_v15 = vpop.f32.mrf.mxu1  ;;  %v752_v25 = vadd.f32 %v1969_v38, %v652_v5  ;;  %v866_v30 = vmax.f32 %v850_v44, 0.0  ;;  %v839_v24 = vmul.f32 %v1837_v4, %v1945_v14  ;;  %v642_v6 = vmul.f32 %v1831_v62, %v1987_v53  ;;  %v821_v53 = vpop.permute.xlu1 %820 }
 0x1a7   :  { %v654_v35 = vadd.f32 %v638_v22, %v554_v51  ;;  %v553_v12 = vadd.f32 %v1958_v36, %v398_v60  ;;  %v413_v9 = vadd.f32 %v1269_v15, %v1859_v63  ;;  %1312 = vmatmul.mubr.f32.gmra.mxu0 %v864_v41  ;;  %v865_v29 = vmax.f32 %v849_v33, 0.0 }
 0x1a8   :  { %v407_v40 = vpop.f32.mrf.mxu1  ;;  %v751_v7 = vadd.f32 %v1965_v19, %v651_v20  ;;  %v852_v8 = vadd.f32 %v836_v13, %v752_v25  ;;  %v840_v57 = vmul.f32 %v1837_v4, %v813_v17  ;;  %v742_v14 = vmul.f32 %v1833_v2, %v721_v18 }
 0x1a9   :  { %v653_v32 = vadd.f32 %v1980_v23, %v553_v12  ;;  %v556_v38 = vadd.f32 %v540_v52, %v413_v9  ;;  %v408_v22 = vadd.f32 %v1859_v63, %v407_v40  ;;  %1314 = vmatprep.mubr.f32.mxu0 %v865_v29  ;;  %v754_v36 = vadd.f32 %v1975_v43, %v654_v35 }
 0x1aa   :  { %v1272_v46 = vpop.f32.mrf.mxu1  ;;  %v851_v19 = vadd.f32 %v2091_v10, %v751_v7  ;;  %v868_v49 = vmax.f32 %v852_v8, 0.0  ;;  %v741_v58 = vmul.f32 %v1833_v2, %v2011_v34  ;;  %v842_v44 = vmul.f32 %v1837_v4, %v821_v53 }
 0x1ab   :  { %v656_v13 = vadd.f32 %v640_v39, %v556_v38  ;;  %v555_v23 = vadd.f32 %v1954_v16, %v408_v22  ;;  %v423_v52 = vadd.f32 %v1272_v46, %v1859_v63  ;;  %1315 = vmatmul.mubr.f32.gmra.mxu0 %v866_v30  ;;  %v753_v54 = vadd.f32 %v2004_v45, %v653_v32  ;;  %v817_v39 = vpop.permute.xlu0 %816 }
 0x1ac   :  { %v417_v43 = vpop.f32.mrf.mxu1  ;;  %v867_v61 = vmax.f32 %v851_v19, 0.0  ;;  %v854_v5 = vadd.f32 %v838_v1, %v754_v36  ;;  %v641_v16 = vmul.f32 %v1831_v62, %v617_v59  ;;  %v841_v51 = vmul.f32 %v1837_v4, %v817_v39  ;;  %v1106_v4 = vld [vmem:[%s2078_s6 + $0x2] ss:$0 sm:$0xff]  ;;  %s1395_s6 = smov [#allocation2]  }
 0x1ad   :  { %v655_v47 = vadd.f32 %v639_v37, %v555_v23  ;;  %v558_v31 = vadd.f32 %v542_v48, %v423_v52  ;;  %v756_v27 = vadd.f32 %v740_v56, %v656_v13  ;;  %v418_v11 = vadd.f32 %v1859_v63, %v417_v43  ;;  %s1080_s12 = sshll.u32 %s1395_s6, 4  ;;  %s1081_s12 = int_to_ptr.vmem [resolvable:$true] %s1080_s12 }
 0x1ae   :  { %1317 = vmatprep.mubr.f32.mxu0 %v867_v61  ;;  %v853_v45 = vadd.f32 %v2021_v42, %v753_v54  ;;  %v870_v63 = vmax.f32 %v854_v5, 0.0  ;;  %s1369_s13 = scalar_lea.vmem %s1081_s12, 16  ;;  %s1373_s14 = scalar_lea.vmem %s1081_s12, 32 }
 0x1af   :  { %v557_v41 = vadd.f32 %v541_v21, %v418_v11  ;;  %1318 = vmatmul.mubr.f32.gmra.mxu0 %v868_v49  ;;  %v658_v28 = vadd.f32 %v642_v6, %v558_v31  ;;  %v755_v37 = vadd.f32 %v1984_v26, %v655_v47  ;;  %v856_v60 = vadd.f32 %v840_v57, %v756_v27  ;;  %p1370_p0 = scmp.ne.s32.totalorder %s1081_s12, %s1369_s13  ;;  %p1374_p1 = scmp.lt.s32.totalorder %s1081_s12, %s1081_s12 }
 0x1b0   :  { %v869_v20 = vmax.f32 %v853_v45, 0.0  ;;  %p1375_p2 = scmp.lt.s32.totalorder %s1373_s14, %s1369_s13 }
 0x1b1   :  { %v657_v33 = vadd.f32 %v641_v16, %v557_v41  ;;  %v758_v62 = vadd.f32 %v742_v14, %v658_v28  ;;  %v855_v59 = vadd.f32 %v839_v24, %v755_v37  ;;  %v872_v50 = vmax.f32 %v856_v60, 0.0 }
 0x1b2   :  { %1320 = vmatprep.mubr.f32.mxu0 %v869_v20  ;;  %p1376_p3 = por %p1375_p2, %p1374_p1 }
 0x1b3   :  { %v757_v2 = vadd.f32 %v741_v58, %v657_v33  ;;  %1321 = vmatmul.mubr.f32.gmra.mxu0 %v870_v63  ;;  %v858_v34 = vadd.f32 %v842_v44, %v758_v62  ;;  %v871_v42 = vmax.f32 %v855_v59, 0.0 }
 0x1b4   :  { %p1377_p4 = pnand %p1376_p3, %p1370_p0 }
 0x1b5   :  { %v857_v1 = vadd.f32 %v841_v51, %v757_v2  ;;  %1323 = vmatprep.mubr.f32.mxu0 %v871_v42  ;;  %v874_v21 = vmax.f32 %v858_v34, 0.0 }
 0x1b7   :  { %v873_v55 = vmax.f32 %v857_v1, 0.0  ;;  %1324 = vmatmul.mubr.f32.gmra.mxu0 %v872_v50 }
 0x1b9   :  { %1326 = vmatprep.mubr.f32.mxu0 %v873_v55 }
 0x1bb   :  { %1327 = vmatmul.mubr.f32.gmra.mxu0 %v874_v21 }
 0x25f   :  { %v1307_v26 = vpop.f32.mrf.mxu0 }
 0x260   :  { %v968_v25 = vadd.f32 %v1307_v26, %v1106_v4 }
 0x261   :  { %v962_v0 = vpop.f32.mrf.mxu0 }
 0x262   :  { %v963_v48 = vadd.f32 %v1106_v4, %v962_v0 }
 0x263   :  { %v1310_v15 = vpop.f32.mrf.mxu0 }
 0x264   :  { %1041 = vxpose.xlu0.b32.start [1/16] (narrow) %v963_v48, 8  ;;  %v978_v9 = vadd.f32 %v1310_v15, %v1106_v4 }
 0x265   :  { %v972_v18 = vpop.f32.mrf.mxu0 }
 0x266   :  { %v973_v35 = vadd.f32 %v1106_v4, %v972_v18 }
 0x267   :  { %v1313_v12 = vpop.f32.mrf.mxu0 }
 0x268   :  { %1042 = vxpose.xlu0.b32.cont [2/16] (narrow) %v968_v25, 8  ;;  %v988_v56 = vadd.f32 %v1313_v12, %v1106_v4 }
 0x269   :  { %v982_v29 = vpop.f32.mrf.mxu0 }
 0x26a   :  { %v983_v17 = vadd.f32 %v1106_v4, %v982_v29 }
 0x26b   :  { %v1316_v3 = vpop.f32.mrf.mxu0 }
 0x26c   :  { %1043 = vxpose.xlu0.b32.cont [3/16] (narrow) %v973_v35, 8  ;;  %v998_v8 = vadd.f32 %v1316_v3, %v1106_v4 }
 0x26d   :  { %v992_v40 = vpop.f32.mrf.mxu0 }
 0x26e   :  { %v993_v30 = vadd.f32 %v1106_v4, %v992_v40 }
 0x26f   :  { %v1319_v7 = vpop.f32.mrf.mxu0 }
 0x270   :  { %1044 = vxpose.xlu0.b32.cont [4/16] (narrow) %v978_v9, 8  ;;  %v1008_v36 = vadd.f32 %v1319_v7, %v1106_v4 }
 0x271   :  { %v1002_v32 = vpop.f32.mrf.mxu0 }
 0x272   :  { %v1003_v38 = vadd.f32 %v1106_v4, %v1002_v32 }
 0x273   :  { %v1322_v22 = vpop.f32.mrf.mxu0 }
 0x274   :  { %1045 = vxpose.xlu0.b32.cont [5/16] (narrow) %v983_v17, 8  ;;  %v1018_v57 = vadd.f32 %v1322_v22, %v1106_v4 }
 0x275   :  { %v1012_v24 = vpop.f32.mrf.mxu0 }
 0x276   :  { %v1013_v6 = vadd.f32 %v1106_v4, %v1012_v24 }
 0x277   :  { %v1325_v46 = vpop.f32.mrf.mxu0 }
 0x278   :  { %1046 = vxpose.xlu0.b32.cont [6/16] (narrow) %v988_v56, 8  ;;  %v1028_v23 = vadd.f32 %v1325_v46, %v1106_v4 }
 0x279   :  { %v1022_v10 = vpop.f32.mrf.mxu0 }
 0x27a   :  { %v1023_v19 = vadd.f32 %v1106_v4, %v1022_v10 }
 0x27b   :  { %v1328_v13 = vpop.f32.mrf.mxu0 }
 0x27c   :  { %1047 = vxpose.xlu0.b32.cont [7/16] (narrow) %v993_v30, 8  ;;  %v1038_v43 = vadd.f32 %v1328_v13, %v1106_v4 }
 0x27d   :  { %v1032_v52 = vpop.f32.mrf.mxu0 }
 0x27e   :  { %v1033_v54 = vadd.f32 %v1106_v4, %v1032_v52 }
 0x280   :  { %1048 = vxpose.xlu0.b32.cont [8/16] (narrow) %v998_v8, 8 }
 0x284   :  { %1049 = vxpose.xlu0.b32.cont [9/16] (narrow) %v1003_v38, 8 }
 0x288   :  { %1050 = vxpose.xlu0.b32.cont [10/16] (narrow) %v1008_v36, 8 }
 0x28c   :  { %1051 = vxpose.xlu0.b32.cont [11/16] (narrow) %v1013_v6, 8 }
 0x290   :  { %1052 = vxpose.xlu0.b32.cont [12/16] (narrow) %v1018_v57, 8 }
 0x294   :  { %1053 = vxpose.xlu0.b32.cont [13/16] (narrow) %v1023_v19, 8 }
 0x298   :  { %1054 = vxpose.xlu0.b32.cont [14/16] (narrow) %v1028_v23, 8 }
 0x29c   :  { %1055 = vxpose.xlu0.b32.cont [15/16] (narrow) %v1033_v54, 8 }
 0x2a0   :  { %1056 = vxpose.xlu0.b32.end [16/16] (narrow) %v1038_v43, 8 }
 0x2e0   :  { %v1057_v61 = vpop.trf.xlu0 }
 0x2e1   :  { %1073 = vst [vmem:[#allocation2] sm:$0x1] %v1057_v61 }
 0x2e2   :  { %1380 = shalt.err (!%p1377_p4)
}
 0x2e3   :  { %1083 = dma.vmem_to_hbm [thread:$0]  %s1081_s12, 16, %s2079_s7, [#allocation3]  }
 0x2e4   :  { %1389 = dma.done.wait [#allocation3], 16  }
 0x2e5   :  { %1390 = vsyncadd [#allocation3], 4294967280 }
 0x2e6   :  { %1087 = vsyncpa [#allocation3], 1 }

</bundles_post_ra>
